<compile_context>
chip_gen: v7x
topology: tpu7x:2x2x1
jax: 0.10.0
libtpu: 0.0.40
codegen_flags: <defaults>
</compile_context>

<pallas_src>
import functools

import jax
import jax.numpy as jnp
from jax.experimental import pallas as pl
from jax.experimental.pallas import tpu as pltpu


def _round_up(x, m):
    return ((x + m - 1) // m) * m


def _proj_kernel(p_ref, w_ref, b_ref, o_ref):
    # p_ref: (tm, Kp) patches, w_ref: (Kp, tn) weight, b_ref: (1, tn) f32 bias,
    # o_ref: (tm, tn).  f32 MXU accumulation, f32 bias add, cast on store.
    acc = jnp.dot(p_ref[...], w_ref[...], preferred_element_type=jnp.float32)
    o_ref[...] = (acc + b_ref[...]).astype(o_ref.dtype)


def _tpu_memory_config():
    """Generation-aware VMEM limit / max M tile (conservative fallback)."""
    try:
        vmem_phys = int(pltpu.get_tpu_info().vmem_capacity_bytes)
    except Exception:  # query unavailable -> assume smallest VMEM (v7x, 64 MiB)
        vmem_phys = 64 * 1024 * 1024
    # ~48 MiB scoped on v7x, ~96 MiB on v5e/v6e (128 MiB physical).
    vmem_limit = max(32 * 1024 * 1024,
                     min(vmem_phys * 3 // 4, 96 * 1024 * 1024))
    tm_max = 2048 if vmem_phys >= 100 * 1024 * 1024 else 1024
    return vmem_limit, tm_max


@functools.partial(jax.jit, static_argnames=("patch_size", "stride", "compute_dtype"))
def patch_embed(x, weight, bias, *, patch_size, stride, compute_dtype=jnp.float32):
    """PatchEmbed forward.

    x:      (B, C, H, W)  NCHW
    weight: (embed_dim, C, ph, pw)   (PyTorch Conv2d layout)
    bias:   (embed_dim,)
    Returns (B, num_patches, embed_dim) == proj(x).flatten(2).transpose(1, 2).
    compute_dtype=jnp.bfloat16 is the recommended perf mode on v6e/v7x
    (halves the dominant HBM read; accumulation stays f32).
    """
    B, C, H, W = x.shape
    E, Cw, ph, pw = weight.shape
    assert C == Cw
    assert stride == ph == pw, "non-overlapping patchify path (patch_size == stride)"
    assert H % ph == 0 and W % pw == 0
    Hp, Wp = H // ph, W // pw
    num_patches = Hp * Wp

    # ---- glue: patch extraction (pure layout).  Cast before the transpose so
    # the patch matrix is written once, already in the streaming dtype.
    xc = x.astype(compute_dtype)
    patches = xc.reshape(B, C, Hp, ph, Wp, pw).transpose(0, 2, 4, 1, 3, 5)
    patches = patches.reshape(B * num_patches, C * ph * pw)

    # Conv2d weight (E, C, ph, pw) -> (C*ph*pw, E): strided conv == matmul.
    w2d = weight.reshape(E, C * ph * pw).T.astype(compute_dtype)
    b2d = bias.reshape(1, E).astype(jnp.float32)

    M, K = patches.shape
    in_itemsize = jnp.dtype(compute_dtype).itemsize
    out_dtype = x.dtype
    out_itemsize = jnp.dtype(out_dtype).itemsize

    # ---- alignment / tiling ----
    Kp = _round_up(K, 128)                       # lane-aligned contraction
    Ep = _round_up(E, 128)                       # lane-dense output (unmasked vst)
    sublane = {4: 8, 2: 16, 1: 32}.get(in_itemsize, 8)

    vmem_limit, tm_max = _tpu_memory_config()
    budget = int(vmem_limit * 0.9)
    tm_full = min(tm_max, _round_up(M, sublane))

    # Resident-weight working set: double-buffered patches/output tiles plus
    # the (at most double-buffered) weight + bias.
    def _resident_bytes(tm_):
        return (2 * tm_ * (Kp * in_itemsize + Ep * out_itemsize)
                + 2 * Kp * Ep * in_itemsize + 2 * Ep * 4)

    tm = tm_full
    while tm > sublane and _resident_bytes(tm) > budget:
        tm = max(sublane, _round_up(tm // 2, sublane))
    weight_resident = (_resident_bytes(tm) <= budget) and (tm >= min(tm_full, 256))

    if weight_resident:
        tn = Ep
    else:
        # Fallback for very large weights: tile E too; keep patches resident
        # across the inner E axis.
        tn = 512 if Ep % 512 == 0 else (256 if Ep % 256 == 0 else 128)

        def _tiled_bytes(tm_):
            return (2 * tm_ * (Kp * in_itemsize + tn * out_itemsize)
                    + 2 * Kp * tn * in_itemsize + 2 * tn * 4)

        tm = tm_full
        while tm > sublane and _tiled_bytes(tm) > budget:
            tm = max(sublane, _round_up(tm // 2, sublane))

    Mp = _round_up(M, tm)

    # One-time zero padding only where actually required (standard ViT shapes:
    # K = C*ph*pw = 768, E = 768 are already 128-aligned -> no pad pass).
    if Mp != M or Kp != K:
        patches = jnp.pad(patches, ((0, Mp - M), (0, Kp - K)))
    if Kp != K or Ep != E:
        w2d = jnp.pad(w2d, ((0, Kp - K), (0, Ep - E)))
    if Ep != E:
        b2d = jnp.pad(b2d, ((0, 0), (0, Ep - E)))

    if weight_resident:
        # 1-D grid over M: weight & bias DMA'd once (constant index_map),
        # patches read in one pass, output stores lane-dense over full Ep.
        cost = pl.CostEstimate(
            flops=2 * Mp * Kp * Ep,
            transcendentals=0,
            bytes_accessed=(Mp * Kp + Kp * Ep) * in_itemsize + Ep * 4
                           + Mp * Ep * out_itemsize,
        )
        out = pl.pallas_call(
            _proj_kernel,
            out_shape=jax.ShapeDtypeStruct((Mp, Ep), out_dtype),
            grid_spec=pltpu.PrefetchScalarGridSpec(
                num_scalar_prefetch=0,
                grid=(Mp // tm,),
                in_specs=[
                    pl.BlockSpec((tm, Kp), lambda i: (i, 0)),
                    pl.BlockSpec((Kp, Ep), lambda i: (0, 0)),   # resident weight
                    pl.BlockSpec((1, Ep), lambda i: (0, 0)),    # resident bias
                ],
                out_specs=pl.BlockSpec((tm, Ep), lambda i: (i, 0)),
            ),
            compiler_params=pltpu.CompilerParams(
                dimension_semantics=("parallel",),
                vmem_limit_bytes=vmem_limit,
            ),
            cost_estimate=cost,
        )(patches, w2d, b2d)
    else:
        # 2-D fallback: inner E axis is "arbitrary" so megacore (v7x) shards
        # the M axis only and patch tiles are never duplicated across cores.
        cost = pl.CostEstimate(
            flops=2 * Mp * Kp * Ep,
            transcendentals=0,
            bytes_accessed=(Mp * Kp + (Mp // tm) * Kp * Ep) * in_itemsize + Ep * 4
                           + Mp * Ep * out_itemsize,
        )
        out = pl.pallas_call(
            _proj_kernel,
            out_shape=jax.ShapeDtypeStruct((Mp, Ep), out_dtype),
            grid_spec=pltpu.PrefetchScalarGridSpec(
                num_scalar_prefetch=0,
                grid=(Mp // tm, Ep // tn),
                in_specs=[
                    pl.BlockSpec((tm, Kp), lambda i, j: (i, 0)),  # resident across j
                    pl.BlockSpec((Kp, tn), lambda i, j: (0, j)),
                    pl.BlockSpec((1, tn), lambda i, j: (0, j)),
                ],
                out_specs=pl.BlockSpec((tm, tn), lambda i, j: (i, j)),
            ),
            compiler_params=pltpu.CompilerParams(
                dimension_semantics=("parallel", "arbitrary"),
                vmem_limit_bytes=vmem_limit,
            ),
            cost_estimate=cost,
        )(patches, w2d, b2d)

    # Strip alignment padding; norm_layer=None -> nn.Identity().
    return out[:M, :E].reshape(B, num_patches, E)


if __name__ == "__main__":
    # Small, PatchEmbed-consistent shapes:
    # img_size=16, patch_size=4, stride=4, in_chans=4, embed_dim=32, batch=2.
    B, C, H, W = 2, 4, 16, 16
    patch_size = 4
    stride = 4
    embed_dim = 32

    key = jax.random.PRNGKey(0)
    kx, kw, kb = jax.random.split(key, 3)
    x = jax.random.normal(kx, (B, C, H, W), dtype=jnp.float32)
    # PyTorch Conv2d layout: (out_channels, in_channels, kh, kw).
    weight = jax.random.normal(kw, (embed_dim, C, patch_size, patch_size),
                               dtype=jnp.float32) * 0.02
    bias = jax.random.normal(kb, (embed_dim,), dtype=jnp.float32) * 0.02

    # f32 exact path (default) and bf16-streaming perf path (v6e/v7x).
    out_f32 = patch_embed(x, weight, bias, patch_size=patch_size, stride=stride)
    out_bf16 = patch_embed(x, weight, bias, patch_size=patch_size, stride=stride,
                           compute_dtype=jnp.bfloat16)
    out_f32, out_bf16 = jax.block_until_ready((out_f32, out_bf16))

    # Reference: strided conv == patch matmul.
    ref = jax.lax.conv_general_dilated(
        x, weight, window_strides=(stride, stride), padding="VALID",
        dimension_numbers=("NCHW", "OIHW", "NCHW"))
    ref = ref + bias.reshape(1, embed_dim, 1, 1)
    ref = ref.reshape(B, embed_dim, -1).transpose(0, 2, 1)

    assert out_f32.shape == (B, (H // patch_size) * (W // patch_size), embed_dim)
    assert jnp.allclose(out_f32, ref, atol=1e-4, rtol=1e-4)
    assert jnp.allclose(out_bf16, ref, atol=2e-2, rtol=2e-2)

    print("KERNEL_OK")
</pallas_src>

<mosaic_0001>
module attributes {stable_mosaic.version = 11 : i64} {
  func.func @_proj_kernel(%arg0: i32, %arg1: memref<32x128xf32, #tpu.memory_space<vmem>>, %arg2: memref<128x128xf32, #tpu.memory_space<vmem>>, %arg3: memref<1x128xf32, #tpu.memory_space<vmem>>, %arg4: memref<32x128xf32, #tpu.memory_space<vmem>>) attributes {dimension_semantics = [#tpu.dimension_semantics<parallel>], iteration_bounds = array<i64: 1>, scalar_prefetch = 0 : i64, scratch_operands = 0 : i64, tpu.core_type = #tpu.core_type<tc>, window_params = [{transform_indices = @transform_0, window_bounds = array<i64: 32, 128>}, {pipeline_mode = #tpu.pipeline_mode<synchronous>, transform_indices = @transform_1, window_bounds = array<i64: 128, 128>}, {pipeline_mode = #tpu.pipeline_mode<synchronous>, transform_indices = @transform_2, window_bounds = array<i64: 1, 128>}, {transform_indices = @transform_3, window_bounds = array<i64: 32, 128>}]} {
    %c0 = arith.constant 0 : index
    %c0_0 = arith.constant 0 : index
    %0 = vector.load %arg1[%c0, %c0_0] : memref<32x128xf32, #tpu.memory_space<vmem>>, vector<32x128xf32>
    %c0_1 = arith.constant 0 : index
    %c0_2 = arith.constant 0 : index
    %1 = vector.load %arg2[%c0_1, %c0_2] : memref<128x128xf32, #tpu.memory_space<vmem>>, vector<128x128xf32>
    %cst = arith.constant dense<0.000000e+00> : vector<32x128xf32>
    %2 = tpu.matmul %0, %1, %cst {dimension_numbers = #tpu.dot_dimension_numbers<[1], [0], [0], [1], [0, 0, 1, 1], [], []>} : vector<32x128xf32>, vector<128x128xf32>, vector<32x128xf32> -> vector<32x128xf32>
    %c0_3 = arith.constant 0 : index
    %c0_4 = arith.constant 0 : index
    %3 = vector.load %arg3[%c0_3, %c0_4] : memref<1x128xf32, #tpu.memory_space<vmem>>, vector<1x128xf32>
    %4 = vector.broadcast %3 : vector<1x128xf32> to vector<32x128xf32>
    %5 = arith.addf %2, %4 : vector<32x128xf32>
    %c0_5 = arith.constant 0 : index
    %c0_6 = arith.constant 0 : index
    %6 = vector.load %arg4[%c0_5, %c0_6] : memref<32x128xf32, #tpu.memory_space<vmem>>, vector<32x128xf32>
    tpu.vector_store %arg4[%c0_5, %c0_6], %5 {strides = array<i32>} : memref<32x128xf32, #tpu.memory_space<vmem>>, vector<32x128xf32>,
    return
  }
  func.func @transform_0(%arg0: i32) -> (i32, i32) {
    %c0_i32 = arith.constant 0 : i32
    %c0_i32_0 = arith.constant 0 : i32
    return %arg0, %c0_i32 : i32, i32
  }
  func.func @transform_1(%arg0: i32) -> (i32, i32) {
    %c0_i32 = arith.constant 0 : i32
    %c0_i32_0 = arith.constant 0 : i32
    %c0_i32_1 = arith.constant 0 : i32
    return %c0_i32, %c0_i32_0 : i32, i32
  }
  func.func @transform_2(%arg0: i32) -> (i32, i32) {
    %c0_i32 = arith.constant 0 : i32
    %c0_i32_0 = arith.constant 0 : i32
    %c0_i32_1 = arith.constant 0 : i32
    return %c0_i32, %c0_i32_0 : i32, i32
  }
  func.func @transform_3(%arg0: i32) -> (i32, i32) {
    %c0_i32 = arith.constant 0 : i32
    %c0_i32_0 = arith.constant 0 : i32
    return %arg0, %c0_i32 : i32, i32
  }
}

</mosaic_0001>

<bundles_post_ra>
// kernel: patch_embed.1
= control target key start
LH: loop header
LB: loop body
LE: loop exit
PB: predicated region body
PF: predicated region fallthrough
CT: control target
= control target key end

     0   :  { %s379_s0 = inlined_call_operand.vmem [shape: f32[32,128], index: 0, kind: input, shape index: {}]   ;;  %s380_s1 = inlined_call_operand.vmem [shape: f32[128,128], index: 1, kind: input, shape index: {}]   ;;  %s381_s2 = inlined_call_operand.vmem [shape: f32[1,128], index: 2, kind: input, shape index: {}]   ;;  %s382_s3 = inlined_call_operand.hbm [shape: f32[32,128], index: 3, kind: output, shape index: {}]  }
   0x1   :  { %v19_v0 = vld [vmem:[%s380_s1] sm:$0xff]  ;;  %v20_v1 = vld [vmem:[%s380_s1 + $0x8] sm:$0xff]  ;;  %v21_v2 = vld [vmem:[%s380_s1 + $0x10] sm:$0xff] }
   0x2   :  { %v206_v3 = vpack.c.bf16 %v20_v1, %v19_v0  ;;  %v22_v4 = vld [vmem:[%s380_s1 + $0x18] sm:$0xff]  ;;  %v23_v6 = vld [vmem:[%s380_s1 + $0x20] sm:$0xff]  ;;  %v24_v7 = vld [vmem:[%s380_s1 + $0x28] sm:$0xff] }
   0x3   :  { %v210_v5 = vpack.c.bf16 %v22_v4, %v21_v2  ;;  %v214_v8 = vpack.c.bf16 %v24_v7, %v23_v6  ;;  %v15_v9 = vld [vmem:[%s379_s0] sm:$0xff]  ;;  %v17_v10 = vld [vmem:[%s379_s0 + $0x10] sm:$0xff]  ;;  %v26_v12 = vld [vmem:[%s380_s1 + $0x38] sm:$0xff] }
   0x4   :  { %207 = vmatprep.subr.bf16.mxu0 %v206_v3  ;;  %238 = vmatprep.subr.bf16.mxu1 %v206_v3  ;;  %v25_v11 = vld [vmem:[%s380_s1 + $0x30] sm:$0xff] }
   0x5   :  { %209 = vmatpush3.bf16.msra.mxu0 %v206_v3  ;;  %246 = vmatpush3.bf16.msra.mxu1 %v206_v3 }
   0x6   :  { %211 = vmatprep.subr.bf16.mxu0 %v210_v5  ;;  %239 = vmatprep.subr.bf16.mxu1 %v210_v5 }
   0x7   :  { %200 = vmatprep.mubr.f32.mxu0 %v15_v9  ;;  %203 = vmatprep.mubr.f32.mxu1 %v17_v10 }
   0x8   :  { %8 = vsyncpa [#allocation3], 0  ;;  %v218_v13 = vpack.c.bf16 %v26_v12, %v25_v11  ;;  %v27_v14 = vld [vmem:[%s380_s1 + $0x40] sm:$0xff]  ;;  %v28_v15 = vld [vmem:[%s380_s1 + $0x48] sm:$0xff]  ;;  %s281_s26 = smov [#allocation2]  }
   0x9   :  { %213 = vmatpush3.bf16.msra.mxu0 %v210_v5  ;;  %247 = vmatpush3.bf16.msra.mxu1 %v210_v5  ;;  %v222_v16 = vpack.c.bf16 %v28_v15, %v27_v14  ;;  %v29_v17 = vld [vmem:[%s380_s1 + $0x50] sm:$0xff]  ;;  %v30_v18 = vld [vmem:[%s380_s1 + $0x58] sm:$0xff]  ;;  %v31_v20 = vld [vmem:[%s380_s1 + $0x60] sm:$0xff]  ;;  %s136_s27 = sshll.u32 %s281_s26, 4  ;;  %s137_s27 = int_to_ptr.vmem [resolvable:$true] %s136_s27 }
   0xa   :  { %215 = vmatprep.subr.bf16.mxu0 %v214_v8  ;;  %240 = vmatprep.subr.bf16.mxu1 %v214_v8  ;;  %v226_v19 = vpack.c.bf16 %v30_v18, %v29_v17  ;;  %v32_v21 = vld [vmem:[%s380_s1 + $0x68] sm:$0xff]  ;;  %v33_v23 = vld [vmem:[%s380_s1 + $0x70] sm:$0xff]  ;;  %v34_v24 = vld [vmem:[%s380_s1 + $0x78] sm:$0xff]  ;;  %p262_p1 = scmp.lt.s32.totalorder %s137_s27, %s137_s27 }
   0xb   :  { %v230_v22 = vpack.c.bf16 %v32_v21, %v31_v20  ;;  %v234_v25 = vpack.c.bf16 %v34_v24, %v33_v23  ;;  %v16_v26 = vld [vmem:[%s379_s0 + $0x8] sm:$0xff]  ;;  %v18_v27 = vld [vmem:[%s379_s0 + $0x18] sm:$0xff]  ;;  %v147_v28 = vld [vmem:[%s381_s2] ss:$0 sm:$0xff]  ;;  %s257_s0 = scalar_lea.vmem %s137_s27, 512 }
   0xc   :  { %p258_p0 = scmp.ne.s32.totalorder %s137_s27, %s257_s0  ;;  %p263_p2 = scmp.lt.s32.totalorder %s257_s0, %s257_s0 }
   0xd   :  { %217 = vmatpush3.bf16.msra.mxu0 %v214_v8  ;;  %248 = vmatpush3.bf16.msra.mxu1 %v214_v8 }
   0xe   :  { %219 = vmatprep.subr.bf16.mxu0 %v218_v13  ;;  %241 = vmatprep.subr.bf16.mxu1 %v218_v13  ;;  %p264_p3 = por %p263_p2, %p262_p1 }
  0x10   :  { %p265_p4 = pnand %p264_p3, %p258_p0 }
  0x11   :  { %221 = vmatpush3.bf16.msra.mxu0 %v218_v13  ;;  %249 = vmatpush3.bf16.msra.mxu1 %v218_v13 }
  0x12   :  { %223 = vmatprep.subr.bf16.mxu0 %v222_v16  ;;  %242 = vmatprep.subr.bf16.mxu1 %v222_v16 }
  0x15   :  { %225 = vmatpush3.bf16.msra.mxu0 %v222_v16  ;;  %250 = vmatpush3.bf16.msra.mxu1 %v222_v16 }
  0x16   :  { %227 = vmatprep.subr.bf16.mxu0 %v226_v19  ;;  %243 = vmatprep.subr.bf16.mxu1 %v226_v19 }
  0x19   :  { %229 = vmatpush3.bf16.msra.mxu0 %v226_v19  ;;  %251 = vmatpush3.bf16.msra.mxu1 %v226_v19 }
  0x1a   :  { %231 = vmatprep.subr.bf16.mxu0 %v230_v22  ;;  %244 = vmatprep.subr.bf16.mxu1 %v230_v22 }
  0x1d   :  { %233 = vmatpush3.bf16.msra.mxu0 %v230_v22  ;;  %252 = vmatpush3.bf16.msra.mxu1 %v230_v22 }
  0x1e   :  { %235 = vmatprep.subr.bf16.mxu0 %v234_v25  ;;  %245 = vmatprep.subr.bf16.mxu1 %v234_v25 }
  0x21   :  { %237 = vmatpush3.bf16.msra.mxu0 %v234_v25  ;;  %253 = vmatpush3.bf16.msra.mxu1 %v234_v25 }
  0x24   :  { %201 = vmatmul.mubr.f32.vlgmr.msra.gmra.mrb[0].mxu0 %v16_v26  ;;  %204 = vmatmul.mubr.f32.vlgmr.msra.gmra.mrb[0].mxu1 %v18_v27 }
  0xf7   :  { %v202_v29 = vpop.f32.mrb[0].mxu0  ;;  %v205_v30 = vpop.f32.mrb[0].mxu1 }
  0xf8   :  { %v114_v31 = vadd.f32 %v202_v29, %v147_v28  ;;  %v124_v32 = vadd.f32 %v205_v30, %v147_v28  ;;  %v108_v33 = vpop.f32.mrb[1].mxu0  ;;  %v118_v34 = vpop.f32.mrb[1].mxu1 }
  0xf9   :  { %v109_v35 = vadd.f32 %v147_v28, %v108_v33  ;;  %v119_v36 = vadd.f32 %v147_v28, %v118_v34 }
  0xfa   :  { %128 = vst [vmem:[#allocation2 + $0x8] sm:$0xff] %v114_v31  ;;  %130 = vst [vmem:[#allocation2 + $0x18] sm:$0xff] %v124_v32 }
  0xfb   :  { %127 = vst [vmem:[#allocation2] sm:$0xff] %v109_v35  ;;  %129 = vst [vmem:[#allocation2 + $0x10] sm:$0xff] %v119_v36 }
  0xfc   :  { %268 = shalt.err (!%p265_p4)
}
  0xfd   :  { %s269_s29 = scalar_lea.hbm %s382_s3, 512 }
  0xfe   :  { %p270_p5 = scmp.ne.s32.totalorder %s382_s3, %s269_s29  ;;  %p273_p6 = scmp.lt.u32.totalorder %s269_s29, %s382_s3 }
 0x100   :  { %p275_p7 = pnand %p273_p6, %p270_p5 }
 0x102   :  { %278 = shalt.err (!%p275_p7)
}
 0x103   :  { %s282_s7 = smov 128   ;;  %s283_s8 = smov 8  }
 0x104   :  { %142 = dma.vmem_to_hbm [thread:$0]  %s137_s27, 512, %s382_s3, [#allocation3], %s282_s7, %s282_s7, %s283_s8  }
 0x105   :  { %279 = dma.done.wait [#allocation3], 512  }
 0x106   :  { %280 = vsyncadd [#allocation3], 4294966784 }
 0x107   :  { %146 = vsyncpa [#allocation3], 1 }

</bundles_post_ra>
